<compile_context>
chip_gen: v7x
topology: tpu7x:2x2x1
jax: 0.10.0
libtpu: 0.0.40
codegen_flags: <defaults>
</compile_context>

<pallas_src>
import functools

import jax
import jax.numpy as jnp
from jax.experimental import pallas as pl
from jax.experimental.pallas import tpu as pltpu

# ----------------------- small ViT config (synthetic) -----------------------
IMG = 32           # image size   (real BLIP: 384)
PATCH = 16         # patch size   (same as real BLIP ViT-base)
CIN = 3            # RGB
DIM = 128          # embed dim    (real: 768) -- lane-dense (multiple of 128)
DEPTH = 2          # blocks       (real: 12)
HEADS = 4          # heads        (real: 12)
DH = DIM // HEADS  # head dim
MLP = 4 * DIM      # mlp hidden
BATCH = 2
LN_EPS = 1e-6      # BLIP ViT uses LayerNorm(eps=1e-6)


# ------------------------------ Pallas kernels -------------------------------
def _linear_kernel(x_ref, w_ref, b_ref, o_ref):
    y = jnp.dot(x_ref[...], w_ref[...], preferred_element_type=jnp.float32)
    o_ref[...] = (y + b_ref[...]).astype(o_ref.dtype)


def linear(x, w, b, tm=256):
    """Row-tiled x:[M,K] @ w:[K,N] + b:[N]; weight stays resident across the grid."""
    M, K = x.shape
    N = w.shape[1]
    tm = min(tm, M)
    return pl.pallas_call(
        _linear_kernel,
        out_shape=jax.ShapeDtypeStruct((M, N), x.dtype),
        grid=(pl.cdiv(M, tm),),
        in_specs=[
            pl.BlockSpec((tm, K), lambda i: (i, 0)),
            pl.BlockSpec((K, N), lambda i: (0, 0)),
            pl.BlockSpec((1, N), lambda i: (0, 0)),
        ],
        out_specs=pl.BlockSpec((tm, N), lambda i: (i, 0)),
        compiler_params=pltpu.CompilerParams(dimension_semantics=("parallel",)),
    )(x, w, b.reshape(1, N))


def _block_kernel(x_ref, qkvw_ref, qkvb_ref, projw_ref, projb_ref,
                  w1_ref, b1_ref, w2_ref, b2_ref, o_ref, *, heads, eps):
    """One fused transformer block per grid step (grid over batch):
         y = x + proj(MHSA(LN1(x)));  out = y + fc2(GELU(fc1(LN2(y))))
    LN1/LN2 gamma/beta and the attention scale are pre-folded into
    qkv_w/qkv_b and fc1_w/fc1_b, so only mean/var normalization remains."""
    x = x_ref[0].astype(jnp.float32)                     # [N, D]
    N, D = x.shape
    dh = D // heads

    # ---------------- attention sub-block ----------------
    mu = jnp.mean(x, axis=-1, keepdims=True)
    xc = x - mu
    var = jnp.mean(xc * xc, axis=-1, keepdims=True)
    h = (xc * jax.lax.rsqrt(var + eps)).astype(qkvw_ref.dtype)

    # fused QKV projection (attention scale already folded into the Q columns)
    qkv = jnp.dot(h, qkvw_ref[...], preferred_element_type=jnp.float32)
    qkv = qkv + qkvb_ref[...]                            # [N, 3D] f32

    pw = projw_ref[...]                                  # [D, D] bf16, resident
    acc = jnp.zeros((N, D), jnp.float32)
    for hd in range(heads):                              # static unroll
        lo = hd * dh
        q = qkv[:, lo:lo + dh].astype(jnp.bfloat16)
        k = qkv[:, D + lo:D + lo + dh].astype(jnp.bfloat16)
        v = qkv[:, 2 * D + lo:2 * D + lo + dh].astype(jnp.bfloat16)
        # scores: contract the head dim of q and k directly (no k.T / XLU transpose)
        s = jax.lax.dot_general(q, k, (((1,), (1,)), ((), ())),
                                preferred_element_type=jnp.float32)
        s = s - jnp.max(s, axis=-1, keepdims=True)
        p = jnp.exp(s)
        p = p * pl.reciprocal(jnp.sum(p, axis=-1, keepdims=True), approx=True)
        o = jnp.dot(p.astype(jnp.bfloat16), v, preferred_element_type=jnp.float32)
        # push this head's output through its rows of the projection weight:
        # avoids any head-concat / transpose / reshape inside the kernel.
        acc = acc + jnp.dot(o.astype(jnp.bfloat16), pw[lo:lo + dh, :],
                            preferred_element_type=jnp.float32)

    x = x + acc + projb_ref[...]                         # residual 1 (f32)

    # ---------------- MLP sub-block ----------------
    mu = jnp.mean(x, axis=-1, keepdims=True)
    xc = x - mu
    var = jnp.mean(xc * xc, axis=-1, keepdims=True)
    h = (xc * jax.lax.rsqrt(var + eps)).astype(w1_ref.dtype)
    h = jnp.dot(h, w1_ref[...], preferred_element_type=jnp.float32) + b1_ref[...]
    h = jax.nn.gelu(h, approximate=False)                # matches nn.GELU (erf)
    h = jnp.dot(h.astype(w2_ref.dtype), w2_ref[...],
                preferred_element_type=jnp.float32) + b2_ref[...]

    o_ref[0] = (x + h).astype(o_ref.dtype)               # residual 2


def transformer_block(x, blk, heads=HEADS, eps=LN_EPS):
    """x: [B, N, D] -> one full transformer block, single pallas_call over batch."""
    B, N, D = x.shape
    Hd = blk["fc1_w"].shape[1]
    kernel = functools.partial(_block_kernel, heads=heads, eps=eps)
    return pl.pallas_call(
        kernel,
        out_shape=jax.ShapeDtypeStruct((B, N, D), x.dtype),
        grid=(B,),
        in_specs=[
            pl.BlockSpec((1, N, D), lambda i: (i, 0, 0)),
            pl.BlockSpec((D, 3 * D), lambda i: (0, 0)),
            pl.BlockSpec((1, 3 * D), lambda i: (0, 0)),
            pl.BlockSpec((D, D), lambda i: (0, 0)),
            pl.BlockSpec((1, D), lambda i: (0, 0)),
            pl.BlockSpec((D, Hd), lambda i: (0, 0)),
            pl.BlockSpec((1, Hd), lambda i: (0, 0)),
            pl.BlockSpec((Hd, D), lambda i: (0, 0)),
            pl.BlockSpec((1, D), lambda i: (0, 0)),
        ],
        out_specs=pl.BlockSpec((1, N, D), lambda i: (i, 0, 0)),
        compiler_params=pltpu.CompilerParams(dimension_semantics=("parallel",)),
    )(x,
      blk["qkv_w"], blk["qkv_b"].reshape(1, 3 * D),
      blk["proj_w"], blk["proj_b"].reshape(1, D),
      blk["fc1_w"], blk["fc1_b"].reshape(1, Hd),
      blk["fc2_w"], blk["fc2_b"].reshape(1, D))


def _layernorm_kernel(x_ref, g_ref, b_ref, o_ref, *, eps):
    x = x_ref[...].astype(jnp.float32)
    mu = jnp.mean(x, axis=-1, keepdims=True)
    xc = x - mu
    var = jnp.mean(xc * xc, axis=-1, keepdims=True)
    y = xc * jax.lax.rsqrt(var + eps) * g_ref[...] + b_ref[...]
    o_ref[...] = y.astype(o_ref.dtype)


def layernorm(x, g, b, eps=LN_EPS, tm=512):
    M, D = x.shape
    tm = min(tm, M)
    return pl.pallas_call(
        functools.partial(_layernorm_kernel, eps=eps),
        out_shape=jax.ShapeDtypeStruct((M, D), jnp.float32),
        grid=(pl.cdiv(M, tm),),
        in_specs=[
            pl.BlockSpec((tm, D), lambda i: (i, 0)),
            pl.BlockSpec((1, D), lambda i: (0, 0)),
            pl.BlockSpec((1, D), lambda i: (0, 0)),
        ],
        out_specs=pl.BlockSpec((tm, D), lambda i: (i, 0)),
        compiler_params=pltpu.CompilerParams(dimension_semantics=("parallel",)),
    )(x, g.reshape(1, D), b.reshape(1, D))


# --------------------------- parameter construction --------------------------
def init_params(key):
    keys = iter(jax.random.split(key, 4 + 8 * DEPTH))

    def nrm(shape, std=0.02):
        return jax.random.normal(next(keys), shape, jnp.float32) * std

    params = {
        # patch embed: Conv2d(CIN, DIM, k=PATCH, s=PATCH) as a linear on
        # flattened patches; weight layout [CIN*P*P, DIM] with (C, ph, pw) order
        "patch_w": nrm((CIN * PATCH * PATCH, DIM)),
        "patch_b": nrm((DIM,)),
        "cls_token": nrm((1, 1, DIM)),
        "pos_embed": nrm((1, (IMG // PATCH) ** 2 + 1, DIM)),
        "norm_g": jnp.ones((DIM,), jnp.float32),
        "norm_b": jnp.zeros((DIM,), jnp.float32),
        "blocks": [],
    }
    for _ in range(DEPTH):
        params["blocks"].append({
            "ln1_g": jnp.ones((DIM,), jnp.float32),
            "ln1_b": jnp.zeros((DIM,), jnp.float32),
            "qkv_w": nrm((DIM, 3 * DIM)),
            "qkv_b": nrm((3 * DIM,)),
            "proj_w": nrm((DIM, DIM)),
            "proj_b": nrm((DIM,)),
            "ln2_g": jnp.ones((DIM,), jnp.float32),
            "ln2_b": jnp.zeros((DIM,), jnp.float32),
            "fc1_w": nrm((DIM, MLP)),
            "fc1_b": nrm((MLP,)),
            "fc2_w": nrm((MLP, DIM)),
            "fc2_b": nrm((DIM,)),
        })
    return params


def prepare_params(params):
    """Eval-time preprocessing (pure algebra, done once in f32):
      * fold LN1 gamma/beta into qkv_w / qkv_b, LN2 gamma/beta into fc1_w / fc1_b
      * fold the attention scale (DH**-0.5) into the Q columns of qkv
      * cast weight matrices to bf16 (biases stay f32; added to f32 accumulators)
    """
    scale = DH ** -0.5
    prepped = {
        "patch_w": params["patch_w"].astype(jnp.bfloat16),
        "patch_b": params["patch_b"],
        "cls_token": params["cls_token"].astype(jnp.bfloat16),
        "pos_embed": params["pos_embed"].astype(jnp.bfloat16),
        "norm_g": params["norm_g"],
        "norm_b": params["norm_b"],
        "blocks": [],
    }
    qscale = jnp.concatenate(
        [jnp.full((DIM,), scale, jnp.float32), jnp.ones((2 * DIM,), jnp.float32)], 0)
    for blk in params["blocks"]:
        qkv_w = blk["ln1_g"][:, None] * blk["qkv_w"]
        qkv_b = blk["qkv_b"] + blk["ln1_b"] @ blk["qkv_w"]
        qkv_w = qkv_w * qscale[None, :]
        qkv_b = qkv_b * qscale
        fc1_w = blk["ln2_g"][:, None] * blk["fc1_w"]
        fc1_b = blk["fc1_b"] + blk["ln2_b"] @ blk["fc1_w"]
        prepped["blocks"].append({
            "qkv_w": qkv_w.astype(jnp.bfloat16),
            "qkv_b": qkv_b,
            "proj_w": blk["proj_w"].astype(jnp.bfloat16),
            "proj_b": blk["proj_b"],
            "fc1_w": fc1_w.astype(jnp.bfloat16),
            "fc1_b": fc1_b,
            "fc2_w": blk["fc2_w"].astype(jnp.bfloat16),
            "fc2_b": blk["fc2_b"],
        })
    return prepped


# --------------------------------- forward -----------------------------------
def blip_image_forward(prepped, image):
    """image: [B, C, H, W] (NCHW) -> image_embeds: [B, 1 + (H//P)*(W//P), DIM]."""
    B, C, H, W = image.shape
    hp, wp = H // PATCH, W // PATCH

    # TODO(synk): patch extraction / cls-concat / pos-add kept as plain-JAX glue
    # (one cheap pass each); all matmul/LN/softmax compute runs in Pallas.
    x = image.reshape(B, C, hp, PATCH, wp, PATCH)
    x = x.transpose(0, 2, 4, 1, 3, 5).reshape(B * hp * wp, C * PATCH * PATCH)
    x = x.astype(jnp.bfloat16)

    # patch embedding (Pallas row-tiled matmul, bf16 in / bf16 out, f32 accum)
    x = linear(x, prepped["patch_w"], prepped["patch_b"]).reshape(B, hp * wp, DIM)

    # cls token + positional embedding
    cls = jnp.broadcast_to(prepped["cls_token"], (B, 1, DIM))
    x = jnp.concatenate([cls, x], axis=1)
    ntok = x.shape[1]
    x = x + prepped["pos_embed"][:, :ntok, :]
    # note: pos_drop / attn_drop / proj_drop / drop_path are identity at eval

    # fused transformer blocks: one pallas_call per block, grid over batch
    for blk in prepped["blocks"]:
        x = transformer_block(x, blk)

    # final LayerNorm (f32 output)
    x = layernorm(x.reshape(B * ntok, DIM), prepped["norm_g"], prepped["norm_b"])
    return x.reshape(B, ntok, DIM)


if __name__ == "__main__":
    key = jax.random.PRNGKey(0)
    k_img, k_par = jax.random.split(key)
    image = jax.random.normal(k_img, (BATCH, CIN, IMG, IMG), jnp.float32)
    params = init_params(k_par)
    prepped = prepare_params(params)

    image_embeds = blip_image_forward(prepped, image)
    jax.block_until_ready(image_embeds)

    expected = (BATCH, (IMG // PATCH) ** 2 + 1, DIM)
    assert image_embeds.shape == expected, (image_embeds.shape, expected)
    assert bool(jnp.all(jnp.isfinite(image_embeds)))
    print("KERNEL_OK")
</pallas_src>

<mosaic_0001>
module attributes {stable_mosaic.version = 11 : i64} {
  func.func @_linear_kernel(%arg0: i32, %arg1: memref<8x768xbf16, #tpu.memory_space<vmem>>, %arg2: memref<768x128xbf16, #tpu.memory_space<vmem>>, %arg3: memref<1x128xf32, #tpu.memory_space<vmem>>, %arg4: memref<8x128xbf16, #tpu.memory_space<vmem>>) attributes {dimension_semantics = [#tpu.dimension_semantics<parallel>], iteration_bounds = array<i64: 1>, scalar_prefetch = 0 : i64, scratch_operands = 0 : i64, tpu.core_type = #tpu.core_type<tc>, window_params = [{transform_indices = @transform_0, window_bounds = array<i64: 8, 768>}, {pipeline_mode = #tpu.pipeline_mode<synchronous>, transform_indices = @transform_1, window_bounds = array<i64: 768, 128>}, {pipeline_mode = #tpu.pipeline_mode<synchronous>, transform_indices = @transform_2, window_bounds = array<i64: 1, 128>}, {transform_indices = @transform_3, window_bounds = array<i64: 8, 128>}]} {
    %c0 = arith.constant 0 : index
    %c0_0 = arith.constant 0 : index
    %0 = vector.load %arg1[%c0, %c0_0] : memref<8x768xbf16, #tpu.memory_space<vmem>>, vector<8x768xbf16>
    %c0_1 = arith.constant 0 : index
    %c0_2 = arith.constant 0 : index
    %1 = vector.load %arg2[%c0_1, %c0_2] : memref<768x128xbf16, #tpu.memory_space<vmem>>, vector<768x128xbf16>
    %cst = arith.constant dense<0.000000e+00> : vector<8x128xf32>
    %2 = tpu.matmul %0, %1, %cst {dimension_numbers = #tpu.dot_dimension_numbers<[1], [0], [0], [1], [0, 0, 1, 1], [], []>} : vector<8x768xbf16>, vector<768x128xbf16>, vector<8x128xf32> -> vector<8x128xf32>
    %c0_3 = arith.constant 0 : index
    %c0_4 = arith.constant 0 : index
    %3 = vector.load %arg3[%c0_3, %c0_4] : memref<1x128xf32, #tpu.memory_space<vmem>>, vector<1x128xf32>
    %4 = vector.broadcast %3 : vector<1x128xf32> to vector<8x128xf32>
    %5 = arith.addf %2, %4 : vector<8x128xf32>
    %6 = arith.truncf %5 : vector<8x128xf32> to vector<8x128xbf16>
    %c0_5 = arith.constant 0 : index
    %c0_6 = arith.constant 0 : index
    %7 = vector.load %arg4[%c0_5, %c0_6] : memref<8x128xbf16, #tpu.memory_space<vmem>>, vector<8x128xbf16>
    tpu.vector_store %arg4[%c0_5, %c0_6], %6 {strides = array<i32>} : memref<8x128xbf16, #tpu.memory_space<vmem>>, vector<8x128xbf16>,
    return
  }
  func.func @transform_0(%arg0: i32) -> (i32, i32) {
    %c0_i32 = arith.constant 0 : i32
    %c0_i32_0 = arith.constant 0 : i32
    return %arg0, %c0_i32 : i32, i32
  }
  func.func @transform_1(%arg0: i32) -> (i32, i32) {
    %c0_i32 = arith.constant 0 : i32
    %c0_i32_0 = arith.constant 0 : i32
    %c0_i32_1 = arith.constant 0 : i32
    return %c0_i32, %c0_i32_0 : i32, i32
  }
  func.func @transform_2(%arg0: i32) -> (i32, i32) {
    %c0_i32 = arith.constant 0 : i32
    %c0_i32_0 = arith.constant 0 : i32
    %c0_i32_1 = arith.constant 0 : i32
    return %c0_i32, %c0_i32_0 : i32, i32
  }
  func.func @transform_3(%arg0: i32) -> (i32, i32) {
    %c0_i32 = arith.constant 0 : i32
    %c0_i32_0 = arith.constant 0 : i32
    return %arg0, %c0_i32 : i32, i32
  }
}

</mosaic_0001>

<bundles_post_ra>
// kernel: tpu_custom_call.1
= control target key start
LH: loop header
LB: loop body
LE: loop exit
PB: predicated region body
PF: predicated region fallthrough
CT: control target
= control target key end

     0   :  { %8 = vsyncpa [#allocation3], 0  ;;  %s918_s0 = inlined_call_operand.hbm [shape: bf16[8,768], index: 0, kind: input, shape index: {}]   ;;  %s919_s1 = inlined_call_operand.hbm [shape: bf16[768,128], index: 1, kind: input, shape index: {}]   ;;  %s920_s2 = inlined_call_operand.vmem [shape: f32[1,128], index: 2, kind: input, shape index: {}]   ;;  %s921_s3 = inlined_call_operand.hbm [shape: bf16[8,128], index: 3, kind: output, shape index: {}]  }
   0x1   :  { %9 = vsyncpa [#allocation6], 0 }
   0x2   :  { %10 = vsyncpa [#allocation4], 0  ;;  %s847_s12 = smov [#allocation2]   ;;  %s848_s14 = smov [#allocation5]  }
   0x3   :  { %s17_s13 = sshll.u32 %s847_s12, 4  ;;  %s26_s15 = sshll.u32 %s848_s14, 4  ;;  %s18_s13 = int_to_ptr.vmem [resolvable:$true] %s17_s13  ;;  %s872_s15 = int_to_ptr.vmem [resolvable:$true] %s26_s15 }
   0x4   :  { %s775_s18 = scalar_lea.hbm %s918_s0, 384 }
   0x5   :  { %p776_p0 = scmp.ne.s32.totalorder %s918_s0, %s775_s18  ;;  %p779_p1 = scmp.lt.u32.totalorder %s775_s18, %s918_s0 }
   0x7   :  { %p781_p2 = pnand %p779_p1, %p776_p0 }
   0x9   :  { %784 = shalt.err (!%p781_p2)
}
   0xa   :  { %s785_s23 = scalar_lea.vmem %s18_s13, 384  ;;  %p790_p4 = scmp.lt.s32.totalorder %s18_s13, %s18_s13 }
   0xb   :  { %p786_p3 = scmp.ne.s32.totalorder %s18_s13, %s785_s23  ;;  %p791_p5 = scmp.lt.s32.totalorder %s785_s23, %s785_s23 }
   0xd   :  { %p792_p6 = por %p791_p5, %p790_p4 }
   0xf   :  { %p793_p7 = pnand %p792_p6, %p786_p3 }
  0x11   :  { %796 = shalt.err (!%p793_p7)
}
  0x12   :  { %20 = dma.hbm_to_vmem [thread:$0]  %s918_s0, 384, %s18_s13, [#allocation3]  }
  0x13   :  { %s797_s28 = scalar_lea.hbm %s919_s1, 6144 }
  0x14   :  { %p798_p8 = scmp.ne.s32.totalorder %s919_s1, %s797_s28  ;;  %p801_p9 = scmp.lt.u32.totalorder %s797_s28, %s919_s1 }
  0x16   :  { %p803_p10 = pnand %p801_p9, %p798_p8 }
  0x18   :  { %806 = shalt.err (!%p803_p10)
}
  0x19   :  { %s807_s6 = scalar_lea.vmem %s872_s15, 6144  ;;  %p812_p12 = scmp.lt.s32.totalorder %s872_s15, %s872_s15 }
  0x1a   :  { %p808_p11 = scmp.ne.s32.totalorder %s872_s15, %s807_s6  ;;  %p813_p13 = scmp.lt.s32.totalorder %s807_s6, %s807_s6 }
  0x1c   :  { %p814_p0 = por %p813_p13, %p812_p12 }
  0x1e   :  { %p815_p1 = pnand %p814_p0, %p808_p11 }
  0x20   :  { %818 = shalt.err (!%p815_p1)
}
  0x21   :  { %s849_s0 = smov 64   ;;  %s850_s7 = smov 4  }
  0x22   :  { %32 = dma.hbm_to_vmem [thread:$0]  %s919_s1, 6144, %s872_s15, [#allocation6], %s849_s0, %s849_s0, %s850_s7  }
  0x23   :  { %841 = dma.done.wait [#allocation3], 384  }
  0x24   :  { %842 = vsyncadd [#allocation3], 4294966912 }
  0x25   :  { %843 = dma.done.wait [#allocation6], 6144  }
  0x26   :  { %844 = vsyncadd [#allocation6], 4294961152  ;;  %v721_v0 = vld [vmem:[#allocation5 + $0x40] sm:$0xff]   ;;  %v725_v4 = vld [vmem:[#allocation5 + $0x48] sm:$0xff]   ;;  %s851_s11 = smov [#allocation7]  }
  0x27   :  { %v722_v1 = vld [vmem:[#allocation5] sm:$0xff]   ;;  %650 = vmatprep.subr.bf16.mxu0 %v721_v0  ;;  %v726_v5 = vld [vmem:[#allocation5 + $0x8] sm:$0xff]   ;;  %v729_v8 = vld [vmem:[#allocation5 + $0x50] sm:$0xff]   ;;  %s585_s12 = sshll.u32 %s851_s11, 4  ;;  %s586_s12 = int_to_ptr.vmem [resolvable:$true] %s585_s12 }
  0x28   :  { %v723_v2 = vld [vmem:[#allocation5 + $0xc0] sm:$0xff]   ;;  %651 = vmatpush3.bf16.msra.mxu0 %v722_v1  ;;  %v727_v6 = vld [vmem:[#allocation5 + $0xc8] sm:$0xff]   ;;  %v730_v9 = vld [vmem:[#allocation5 + $0x10] sm:$0xff]   ;;  %p824_p3 = scmp.lt.s32.totalorder %s586_s12, %s586_s12 }
  0x29   :  { %v724_v3 = vld [vmem:[#allocation5 + $0x80] sm:$0xff]   ;;  %672 = vmatprep.subr.bf16.mxu1 %v723_v2  ;;  %652 = vmatprep.subr.bf16.mxu0 %v725_v4  ;;  %v728_v7 = vld [vmem:[#allocation5 + $0x88] sm:$0xff]   ;;  %v731_v10 = vld [vmem:[#allocation5 + $0xd0] sm:$0xff]  }
  0x2a   :  { %673 = vmatpush3.bf16.msra.mxu1 %v724_v3  ;;  %v732_v11 = vld [vmem:[#allocation5 + $0x90] sm:$0xff]   ;;  %v733_v12 = vld [vmem:[#allocation5 + $0x58] sm:$0xff]   ;;  %v737_v16 = vld [vmem:[#allocation5 + $0x60] sm:$0xff]  }
  0x2b   :  { %674 = vmatprep.subr.bf16.mxu1 %v727_v6  ;;  %v734_v13 = vld [vmem:[#allocation5 + $0x18] sm:$0xff]   ;;  %v738_v17 = vld [vmem:[#allocation5 + $0x20] sm:$0xff]   ;;  %v741_v20 = vld [vmem:[#allocation5 + $0x68] sm:$0xff]  }
  0x2c   :  { %653 = vmatpush3.bf16.msra.mxu0 %v726_v5  ;;  %v735_v14 = vld [vmem:[#allocation5 + $0xd8] sm:$0xff]   ;;  %v739_v18 = vld [vmem:[#allocation5 + $0xe0] sm:$0xff]   ;;  %v742_v21 = vld [vmem:[#allocation5 + $0x28] sm:$0xff]  }
  0x2d   :  { %654 = vmatprep.subr.bf16.mxu0 %v729_v8  ;;  %v736_v15 = vld [vmem:[#allocation5 + $0x98] sm:$0xff]   ;;  %v740_v19 = vld [vmem:[#allocation5 + $0xa0] sm:$0xff]   ;;  %v743_v22 = vld [vmem:[#allocation5 + $0xe8] sm:$0xff]  }
  0x2e   :  { %675 = vmatpush3.bf16.msra.mxu1 %v728_v7  ;;  %v744_v23 = vld [vmem:[#allocation5 + $0xa8] sm:$0xff]   ;;  %v745_v24 = vld [vmem:[#allocation5 + $0x70] sm:$0xff]   ;;  %v749_v28 = vld [vmem:[#allocation5 + $0x78] sm:$0xff]  }
  0x2f   :  { %676 = vmatprep.subr.bf16.mxu1 %v731_v10  ;;  %v746_v25 = vld [vmem:[#allocation5 + $0x30] sm:$0xff]   ;;  %v750_v29 = vld [vmem:[#allocation5 + $0x38] sm:$0xff]   ;;  %v42_v31 = vld [vmem:[#allocation2] sm:$0xff] }
  0x30   :  { %655 = vmatpush3.bf16.msra.mxu0 %v730_v9  ;;  %v747_v26 = vld [vmem:[#allocation5 + $0xf0] sm:$0xff]   ;;  %v751_v30 = vld [vmem:[#allocation5 + $0xf8] sm:$0xff]   ;;  %v596_v32 = vcombine.low %v42_v31, %v42_v31  ;;  %v597_v33 = vcombine.high %v42_v31, %v42_v31  ;;  %v755_v35 = vld [vmem:[#allocation5 + $0x140] sm:$0xff]  }
  0x31   :  { %656 = vmatprep.subr.bf16.mxu0 %v733_v12  ;;  %v748_v27 = vld [vmem:[#allocation5 + $0xb0] sm:$0xff]   ;;  %v754_v34 = vld [vmem:[#allocation5 + $0xb8] sm:$0xff]   ;;  %v758_v39 = vld [vmem:[#allocation5 + $0x100] sm:$0xff]  }
  0x32   :  { %677 = vmatpush3.bf16.msra.mxu1 %v732_v11  ;;  %v43_v36 = vld [vmem:[#allocation2 + $0x8] sm:$0xff]  ;;  %489 = vmatprep.mubr.bf16.mxu0 %v597_v33  ;;  %v759_v40 = vld [vmem:[#allocation5 + $0x148] sm:$0xff]   ;;  %v763_v44 = vld [vmem:[#allocation5 + $0x158] sm:$0xff]  }
  0x33   :  { %678 = vmatprep.subr.bf16.mxu1 %v735_v14  ;;  %v598_v37 = vcombine.low %v43_v36, %v43_v36  ;;  %v599_v38 = vcombine.high %v43_v36, %v43_v36  ;;  %v760_v41 = vld [vmem:[#allocation5 + $0x108] sm:$0xff]   ;;  %v761_v42 = vld [vmem:[#allocation5 + $0x150] sm:$0xff]   ;;  %v764_v45 = vld [vmem:[#allocation5 + $0x118] sm:$0xff]  }
  0x34   :  { %657 = vmatpush3.bf16.msra.mxu0 %v734_v13  ;;  %v762_v43 = vld [vmem:[#allocation5 + $0x110] sm:$0xff]   ;;  %v765_v46 = vld [vmem:[#allocation5 + $0x160] sm:$0xff]   ;;  %v44_v48 = vld [vmem:[#allocation2 + $0x10] sm:$0xff] }
  0x35   :  { %658 = vmatprep.subr.bf16.mxu0 %v737_v16  ;;  %529 = vmatprep.mubr.bf16.mxu1 %v599_v38  ;;  %v766_v47 = vld [vmem:[#allocation5 + $0x120] sm:$0xff]   ;;  %v767_v49 = vld [vmem:[#allocation5 + $0x168] sm:$0xff]   ;;  %v601_v50 = vcombine.high %v44_v48, %v44_v48  ;;  %v769_v52 = vld [vmem:[#allocation5 + $0x170] sm:$0xff]   ;;  %v600_v56 = vcombine.low %v44_v48, %v44_v48 }
  0x36   :  { %679 = vmatpush3.bf16.msra.mxu1 %v736_v15  ;;  %v768_v51 = vld [vmem:[#allocation5 + $0x128] sm:$0xff]   ;;  %v770_v53 = vld [vmem:[#allocation5 + $0x130] sm:$0xff]   ;;  %v771_v54 = vld [vmem:[#allocation5 + $0x178] sm:$0xff]  }
  0x37   :  { %680 = vmatprep.subr.bf16.mxu1 %v739_v18  ;;  %v772_v55 = vld [vmem:[#allocation5 + $0x138] sm:$0xff]   ;;  %v595_v58 = vld [vmem:[%s920_s2] ss:$0 sm:$0xff]  ;;  %s819_s2 = scalar_lea.vmem %s586_s12, 64 }
  0x38   :  { %659 = vmatpush3.bf16.msra.mxu0 %v738_v17  ;;  %p820_p2 = scmp.ne.s32.totalorder %s586_s12, %s819_s2  ;;  %p825_p4 = scmp.lt.s32.totalorder %s819_s2, %s819_s2 }
  0x39   :  { %660 = vmatprep.subr.bf16.mxu0 %v741_v20 }
  0x3a   :  { %681 = vmatpush3.bf16.msra.mxu1 %v740_v19  ;;  %p826_p5 = por %p825_p4, %p824_p3 }
  0x3b   :  { %682 = vmatprep.subr.bf16.mxu1 %v743_v22 }
  0x3c   :  { %661 = vmatpush3.bf16.msra.mxu0 %v742_v21  ;;  %p827_p6 = pnand %p826_p5, %p820_p2 }
  0x3d   :  { %662 = vmatprep.subr.bf16.mxu0 %v745_v24 }
  0x3e   :  { %683 = vmatpush3.bf16.msra.mxu1 %v744_v23 }
  0x3f   :  { %684 = vmatprep.subr.bf16.mxu1 %v747_v26 }
  0x40   :  { %663 = vmatpush3.bf16.msra.mxu0 %v746_v25 }
  0x41   :  { %664 = vmatprep.subr.bf16.mxu0 %v749_v28 }
  0x42   :  { %685 = vmatpush3.bf16.msra.mxu1 %v748_v27 }
  0x43   :  { %686 = vmatprep.subr.bf16.mxu1 %v751_v30 }
  0x44   :  { %665 = vmatpush3.bf16.msra.mxu0 %v750_v29 }
  0x45   :  { %694 = vmatprep.subr.bf16.mxu0 %v755_v35 }
  0x46   :  { %687 = vmatpush3.bf16.msra.mxu1 %v754_v34 }
  0x47   :  { %490 = vmatmul.mubr.bf16.vlgmr.msra.gmra.mrb[0].mxu0 %v596_v32 }
  0x48   :  { %695 = vmatpush3.bf16.msra.mxu0 %v758_v39  ;;  %569 = vmatprep.mubr.bf16.mxu0 %v601_v50 }
  0x49   :  { %530 = vmatmul.mubr.bf16.vlgmr.msra.gmra.mrb[0].mxu1 %v598_v37  ;;  %696 = vmatprep.subr.bf16.mxu0 %v759_v40 }
  0x4c   :  { %697 = vmatpush3.bf16.msra.mxu0 %v760_v41 }
  0x4d   :  { %698 = vmatprep.subr.bf16.mxu0 %v761_v42 }
  0x50   :  { %699 = vmatpush3.bf16.msra.mxu0 %v762_v43 }
  0x51   :  { %700 = vmatprep.subr.bf16.mxu0 %v763_v44 }
  0x54   :  { %701 = vmatpush3.bf16.msra.mxu0 %v764_v45 }
  0x55   :  { %702 = vmatprep.subr.bf16.mxu0 %v765_v46 }
  0x58   :  { %703 = vmatpush3.bf16.msra.mxu0 %v766_v47 }
  0x59   :  { %704 = vmatprep.subr.bf16.mxu0 %v767_v49 }
  0x5c   :  { %705 = vmatpush3.bf16.msra.mxu0 %v768_v51 }
  0x5d   :  { %706 = vmatprep.subr.bf16.mxu0 %v769_v52 }
  0x60   :  { %707 = vmatpush3.bf16.msra.mxu0 %v770_v53 }
  0x61   :  { %708 = vmatprep.subr.bf16.mxu0 %v771_v54 }
  0x64   :  { %709 = vmatpush3.bf16.msra.mxu0 %v772_v55 }
  0x67   :  { %570 = vmatmul.mubr.bf16.vlgmr.msra.gmra.mrb[4].mxu0 %v600_v56 }
 0x11a   :  { %v666_v57 = vpop.f32.mrb[0].mxu0 }
 0x11b   :  { %v667_v59 = vpop.f32.mrb[1].mxu0 }
 0x11c   :  { %v668_v60 = vadd.f32 %v667_v59, %v666_v57  ;;  %v669_v61 = vpop.f32.mrb[2].mxu0  ;;  %v688_v62 = vpop.f32.mrb[0].mxu1 }
 0x11d   :  { %v670_v63 = vpop.f32.mrb[3].mxu0  ;;  %v689_v0 = vpop.f32.mrb[1].mxu1 }
 0x11e   :  { %v492_v1 = vadd.f32 %v668_v60, %v595_v58  ;;  %v690_v2 = vadd.f32 %v689_v0, %v688_v62  ;;  %v691_v3 = vpop.f32.mrb[2].mxu1 }
 0x11f   :  { %v692_v4 = vpop.f32.mrb[3].mxu1 }
 0x120   :  { %v532_v5 = vadd.f32 %v690_v2, %v492_v1 }
 0x13a   :  { %v710_v6 = vpop.f32.mrb[4].mxu0 }
 0x13b   :  { %v711_v7 = vpop.f32.mrb[5].mxu0 }
 0x13c   :  { %v712_v8 = vadd.f32 %v711_v7, %v710_v6  ;;  %v713_v9 = vpop.f32.mrb[6].mxu0 }
 0x13d   :  { %v714_v10 = vpop.f32.mrb[7].mxu0 }
 0x13e   :  { %v572_v11 = vadd.f32 %v712_v8, %v532_v5 }
 0x140   :  { %v577_v12 = vpack.c.bf16 %v572_v11, %v572_v11 }
 0x142   :  { %578 = vst [vmem:[#allocation7] sm:$0xf] %v577_v12 }
 0x143   :  { %830 = shalt.err (!%p827_p6)
}
 0x144   :  { %s831_s15 = scalar_lea.hbm %s921_s3, 64 }
 0x145   :  { %p832_p7 = scmp.ne.s32.totalorder %s921_s3, %s831_s15  ;;  %p835_p8 = scmp.lt.u32.totalorder %s831_s15, %s921_s3 }
 0x147   :  { %p837_p9 = pnand %p835_p8, %p832_p7 }
 0x149   :  { %840 = shalt.err (!%p837_p9)
}
 0x14a   :  { %588 = dma.vmem_to_hbm [thread:$0]  %s586_s12, 64, %s921_s3, [#allocation4]  }
 0x14b   :  { %845 = dma.done.wait [#allocation4], 64  }
 0x14c   :  { %846 = vsyncadd [#allocation4], 4294967232 }
 0x14d   :  { %592 = vsyncpa [#allocation3], 1 }
 0x14e   :  { %593 = vsyncpa [#allocation6], 1 }
 0x14f   :  { %594 = vsyncpa [#allocation4], 1 }

</bundles_post_ra>
